<compile_context>
chip_gen: v5e
topology: v5e:2x2
jax: 0.10.0
libtpu: 0.0.40
codegen_flags: <defaults>
</compile_context>

<pallas_src>
from functools import partial

import jax
import jax.numpy as jnp
from jax.experimental import pallas as pl
from jax.experimental.pallas import tpu as pltpu

HIDDEN = 32


def _round_up(x, m):
    return ((x + m - 1) // m) * m


def _mlp_kernel(xT_ref, w1_ref, b1_ref, w2_ref, b2_ref, w3_ref, b3_ref, o_ref):
    # xT_ref: (S, TB) — batch on lanes (dense vregs, dense DMA).
    x = xT_ref[...]
    # Layer 1: (H, S) @ (S, TB) -> (H, TB), f32 accumulation on the MXU.
    h1 = jnp.dot(w1_ref[...], x, preferred_element_type=jnp.float32)
    h1 = jnp.maximum(h1 + b1_ref[...], 0.0)                       # f32 bias/ReLU
    # Layer 2: (H, H) @ (H, TB) -> (H, TB); cast activations to the matmul
    # operand dtype (bf16 path) only for the MXU input.
    h2 = jnp.dot(w2_ref[...], h1.astype(w2_ref.dtype),
                 preferred_element_type=jnp.float32)
    h2 = jnp.maximum(h2 + b2_ref[...], 0.0)
    # Layer 3 (32 -> 1): weighted sublane reduce (VPU mul + XLU reduce)
    # instead of a third serially-dependent MXU matmul.
    out = jnp.sum(w3_ref[...] * h2, axis=0, keepdims=True)        # (1, TB)
    o_ref[...] = out + b3_ref[0]                                  # lane-dense store


def _batch_axis_semantics():
    """Only CORE_PARALLEL actually shards a grid axis across v7x's two
    TensorCores; plain "parallel" is kept for single-TC v5e/v6e."""
    try:
        kind = jax.devices()[0].device_kind.lower()
    except Exception:
        kind = ""
    if "v7" in kind:
        return (pltpu.CORE_PARALLEL,)
    return ("parallel",)


@partial(jax.jit, static_argnames=("compute_dtype", "tile_batch"))
def v_approx_forward(states, params, *, compute_dtype=jnp.bfloat16,
                     tile_batch=8192):
    """Forward pass of VApproximationWithNN.

    states: (batch, state_dims) float32   (or (state_dims,) for a single state)
    params: dict with
        w1 (H, S)   b1 (H, 1)      -- PyTorch Linear weight layout (out, in)
        w2 (H, H)   b2 (H, 1)
        w3 (H, 1)   b3 (1,)        -- w3 is PyTorch W3 (1, H) transposed
    compute_dtype: dtype of the matmul operands (bf16 halves HBM traffic and
        uses the native MXU path; accumulation and bias/ReLU stay in f32).
        Pass jnp.float32 if full input precision is required.
    returns: (batch,) float32 — equivalent to PyTorch's x.flatten()
    """
    if states.ndim == 1:
        states = states[None, :]
    batch, state_dims = states.shape

    w1, b1 = params["w1"], params["b1"]
    w2, b2 = params["w2"], params["b2"]
    w3, b3 = params["w3"], params["b3"]
    hidden = w1.shape[0]

    # Batch tile: forced multiple of 256 (covers the 128-lane vreg and the
    # 256-wide MXU on v6e/v7x).  Default 8192 keeps per-step DMA well above
    # the per-grid-step pipeline overhead while the whole working set
    # (double-buffered xT/out tiles + (32, tb) f32 h1/h2 temporaries) stays
    # ~2.5 MiB, comfortably under every generation's scoped VMEM.
    tb = max(256, _round_up(min(tile_batch, batch), 256))
    b_pad = _round_up(batch, tb)
    num_tiles = b_pad // tb

    # Single cast -> transpose -> pad.  Casting to compute_dtype FIRST halves
    # the wrapper-side intermediate when compute_dtype=bf16; allow_input_fusion
    # below lets XLA fuse this producer into the pallas_call input fetch.
    # (Best case: have the upstream producer emit states already in
    # (state_dims, batch) layout and skip the transpose entirely.)
    xT = jnp.pad(states.astype(compute_dtype).T, ((0, 0), (0, b_pad - batch)))
    w1c = w1.astype(compute_dtype)
    w2c = w2.astype(compute_dtype)

    out = pl.pallas_call(
        _mlp_kernel,
        out_shape=jax.ShapeDtypeStruct((1, b_pad), jnp.float32),
        grid=(num_tiles,),
        in_specs=[
            # States: one batch tile per grid step.  (Bump to
            # pipeline_mode=pl.Buffered(3) only if xprof still shows exposed
            # input DMA after the larger tile.)
            pl.BlockSpec((state_dims, tb), lambda i: (0, i)),
            # Weights / biases: same block every step -> stay VMEM-resident.
            pl.BlockSpec((hidden, state_dims), lambda i: (0, 0)),
            pl.BlockSpec((hidden, 1), lambda i: (0, 0)),
            pl.BlockSpec((hidden, hidden), lambda i: (0, 0)),
            pl.BlockSpec((hidden, 1), lambda i: (0, 0)),
            pl.BlockSpec((hidden, 1), lambda i: (0, 0)),
            # Scalar output bias lives in SMEM (no (8,128) VMEM padding).
            pl.BlockSpec(memory_space=pltpu.MemorySpace.SMEM),
        ],
        out_specs=pl.BlockSpec((1, tb), lambda i: (0, i)),
        compiler_params=pltpu.CompilerParams(
            dimension_semantics=_batch_axis_semantics(),
            vmem_limit_bytes=32 * 1024 * 1024,
            allow_input_fusion=[True, False, False, False, False, False, False],
        ),
    )(xT, w1c, b1, w2c, b2, w3, b3)

    return out[0, :batch]  # drop padding; matches torch .flatten()


def init_params(key, state_dims, hidden=HIDDEN):
    """nn.Linear-style U(-1/sqrt(fan_in), 1/sqrt(fan_in)) init, kernel layout."""
    ks = jax.random.split(key, 6)

    def linear(kw, kb, fan_in, fan_out):
        bound = 1.0 / jnp.sqrt(jnp.float32(fan_in))
        w = jax.random.uniform(kw, (fan_out, fan_in), jnp.float32, -bound, bound)
        b = jax.random.uniform(kb, (fan_out, 1), jnp.float32, -bound, bound)
        return w, b

    w1, b1 = linear(ks[0], ks[1], state_dims, hidden)
    w2, b2 = linear(ks[2], ks[3], hidden, hidden)
    w3, b3 = linear(ks[4], ks[5], hidden, 1)            # w3: (1, H), b3: (1, 1)
    return {"w1": w1, "b1": b1, "w2": w2, "b2": b2,
            "w3": w3.T, "b3": b3.reshape(-1)}           # w3 -> (H, 1), b3 -> (1,)


def _reference(states, params):
    """Pure-JAX f32 reference (forced high precision matmuls)."""
    hp = jax.lax.Precision.HIGHEST
    h = jnp.maximum(jnp.dot(states, params["w1"].T, precision=hp)
                    + params["b1"].T, 0.0)
    h = jnp.maximum(jnp.dot(h, params["w2"].T, precision=hp)
                    + params["b2"].T, 0.0)
    return (jnp.dot(h, params["w3"], precision=hp) + params["b3"]).reshape(-1)


if __name__ == "__main__":
    key = jax.random.PRNGKey(0)
    k_params, k_states, k_states2 = jax.random.split(key, 3)

    state_dims = 4  # small state space, e.g. CartPole-like
    params = init_params(k_params, state_dims)

    # Small batch (like the original demo).
    batch = 8
    states = jax.random.normal(k_states, (batch, state_dims), jnp.float32)
    ref = _reference(states, params)

    # f32 operand path: tight tolerance vs. the f32 reference.
    v_f32 = jax.block_until_ready(
        v_approx_forward(states, params, compute_dtype=jnp.float32))
    assert v_f32.shape == (batch,)
    assert jnp.allclose(v_f32, ref, atol=1e-4, rtol=1e-4)

    # Default bf16-operand path (halved HBM traffic, native MXU on v6e/v7x).
    v_bf16 = jax.block_until_ready(v_approx_forward(states, params))
    assert v_bf16.shape == (batch,)
    assert jnp.allclose(v_bf16, ref, atol=5e-2, rtol=5e-2)

    # Larger, non-tile-aligned batch: exercises padding + multi-step batch grid
    # with VMEM-resident weights.
    batch2 = 600
    states2 = jax.random.normal(k_states2, (batch2, state_dims), jnp.float32)
    ref2 = _reference(states2, params)

    v2 = jax.block_until_ready(
        v_approx_forward(states2, params, compute_dtype=jnp.float32,
                         tile_batch=256))
    assert v2.shape == (batch2,)
    assert jnp.allclose(v2, ref2, atol=1e-4, rtol=1e-4)

    v2_bf16 = jax.block_until_ready(
        v_approx_forward(states2, params, tile_batch=256))
    assert jnp.allclose(v2_bf16, ref2, atol=5e-2, rtol=5e-2)

    print("KERNEL_OK")
</pallas_src>

<mosaic_0001>
module attributes {stable_mosaic.version = 11 : i64} {
  func.func @_mlp_kernel(%arg0: i32, %arg1: memref<4x256xf32, #tpu.memory_space<vmem>>, %arg2: memref<32x4xf32, #tpu.memory_space<vmem>>, %arg3: memref<32x1xf32, #tpu.memory_space<vmem>>, %arg4: memref<32x32xf32, #tpu.memory_space<vmem>>, %arg5: memref<32x1xf32, #tpu.memory_space<vmem>>, %arg6: memref<32x1xf32, #tpu.memory_space<vmem>>, %arg7: memref<1xf32, #tpu.memory_space<smem>>, %arg8: memref<1x256xf32, #tpu.memory_space<vmem>>) attributes {dimension_semantics = [#tpu.dimension_semantics<parallel>], iteration_bounds = array<i64: 1>, scalar_prefetch = 0 : i64, scratch_operands = 0 : i64, tpu.core_type = #tpu.core_type<tc>, window_params = [{transform_indices = @transform_0, window_bounds = array<i64: 4, 256>}, {pipeline_mode = #tpu.pipeline_mode<synchronous>, transform_indices = @transform_1, window_bounds = array<i64: 32, 4>}, {pipeline_mode = #tpu.pipeline_mode<synchronous>, transform_indices = @transform_2, window_bounds = array<i64: 32, 1>}, {pipeline_mode = #tpu.pipeline_mode<synchronous>, transform_indices = @transform_3, window_bounds = array<i64: 32, 32>}, {pipeline_mode = #tpu.pipeline_mode<synchronous>, transform_indices = @transform_4, window_bounds = array<i64: 32, 1>}, {pipeline_mode = #tpu.pipeline_mode<synchronous>, transform_indices = @transform_5, window_bounds = array<i64: 32, 1>}, {transform_indices = @transform_6, window_bounds = array<i64: 1>}, {transform_indices = @transform_7, window_bounds = array<i64: 1, 256>}]} {
    %c0 = arith.constant 0 : index
    %c0_0 = arith.constant 0 : index
    %0 = vector.load %arg1[%c0, %c0_0] : memref<4x256xf32, #tpu.memory_space<vmem>>, vector<4x256xf32>
    %c0_1 = arith.constant 0 : index
    %c0_2 = arith.constant 0 : index
    %1 = vector.load %arg2[%c0_1, %c0_2] : memref<32x4xf32, #tpu.memory_space<vmem>>, vector<32x4xf32>
    %cst = arith.constant dense<0.000000e+00> : vector<32x256xf32>
    %2 = tpu.matmul %1, %0, %cst {dimension_numbers = #tpu.dot_dimension_numbers<[1], [0], [0], [1], [0, 0, 1, 1], [], []>} : vector<32x4xf32>, vector<4x256xf32>, vector<32x256xf32> -> vector<32x256xf32>
    %c0_3 = arith.constant 0 : index
    %c0_4 = arith.constant 0 : index
    %3 = vector.load %arg3[%c0_3, %c0_4] : memref<32x1xf32, #tpu.memory_space<vmem>>, vector<32x1xf32>
    %4 = vector.broadcast %3 : vector<32x1xf32> to vector<32x256xf32>
    %5 = arith.addf %2, %4 : vector<32x256xf32>
    %cst_5 = arith.constant 0.000000e+00 : f32
    %6 = vector.broadcast %cst_5 : f32 to vector<32x256xf32>
    %7 = arith.maximumf %5, %6 : vector<32x256xf32>
    %c0_6 = arith.constant 0 : index
    %c0_7 = arith.constant 0 : index
    %8 = vector.load %arg4[%c0_6, %c0_7] : memref<32x32xf32, #tpu.memory_space<vmem>>, vector<32x32xf32>
    %cst_8 = arith.constant dense<0.000000e+00> : vector<32x256xf32>
    %9 = tpu.matmul %8, %7, %cst_8 {dimension_numbers = #tpu.dot_dimension_numbers<[1], [0], [0], [1], [0, 0, 1, 1], [], []>} : vector<32x32xf32>, vector<32x256xf32>, vector<32x256xf32> -> vector<32x256xf32>
    %c0_9 = arith.constant 0 : index
    %c0_10 = arith.constant 0 : index
    %10 = vector.load %arg5[%c0_9, %c0_10] : memref<32x1xf32, #tpu.memory_space<vmem>>, vector<32x1xf32>
    %11 = vector.broadcast %10 : vector<32x1xf32> to vector<32x256xf32>
    %12 = arith.addf %9, %11 : vector<32x256xf32>
    %cst_11 = arith.constant 0.000000e+00 : f32
    %13 = vector.broadcast %cst_11 : f32 to vector<32x256xf32>
    %14 = arith.maximumf %12, %13 : vector<32x256xf32>
    %c0_12 = arith.constant 0 : index
    %c0_13 = arith.constant 0 : index
    %15 = vector.load %arg6[%c0_12, %c0_13] : memref<32x1xf32, #tpu.memory_space<vmem>>, vector<32x1xf32>
    %16 = vector.broadcast %15 : vector<32x1xf32> to vector<32x256xf32>
    %17 = arith.mulf %16, %14 : vector<32x256xf32>
    %cst_14 = arith.constant dense<0.000000e+00> : vector<256xf32>
    %18 = vector.multi_reduction <add>, %17, %cst_14 [0] : vector<32x256xf32> to vector<256xf32>
    %19 = vector.shape_cast %18 : vector<256xf32> to vector<1x256xf32>
    %c0_15 = arith.constant 0 : index
    %20 = memref.load %arg7[%c0_15] : memref<1xf32, #tpu.memory_space<smem>>
    %21 = vector.broadcast %20 : f32 to vector<1x256xf32>
    %22 = arith.addf %19, %21 : vector<1x256xf32>
    %c0_16 = arith.constant 0 : index
    %c0_17 = arith.constant 0 : index
    %23 = vector.load %arg8[%c0_16, %c0_17] : memref<1x256xf32, #tpu.memory_space<vmem>>, vector<1x256xf32>
    tpu.vector_store %arg8[%c0_16, %c0_17], %22 {strides = array<i32>} : memref<1x256xf32, #tpu.memory_space<vmem>>, vector<1x256xf32>,
    return
  }
  func.func @transform_0(%arg0: i32) -> (i32, i32) {
    %c0_i32 = arith.constant 0 : i32
    %c0_i32_0 = arith.constant 0 : i32
    return %c0_i32, %arg0 : i32, i32
  }
  func.func @transform_1(%arg0: i32) -> (i32, i32) {
    %c0_i32 = arith.constant 0 : i32
    %c0_i32_0 = arith.constant 0 : i32
    %c0_i32_1 = arith.constant 0 : i32
    return %c0_i32, %c0_i32_0 : i32, i32
  }
  func.func @transform_2(%arg0: i32) -> (i32, i32) {
    %c0_i32 = arith.constant 0 : i32
    %c0_i32_0 = arith.constant 0 : i32
    %c0_i32_1 = arith.constant 0 : i32
    return %c0_i32, %c0_i32_0 : i32, i32
  }
  func.func @transform_3(%arg0: i32) -> (i32, i32) {
    %c0_i32 = arith.constant 0 : i32
    %c0_i32_0 = arith.constant 0 : i32
    %c0_i32_1 = arith.constant 0 : i32
    return %c0_i32, %c0_i32_0 : i32, i32
  }
  func.func @transform_4(%arg0: i32) -> (i32, i32) {
    %c0_i32 = arith.constant 0 : i32
    %c0_i32_0 = arith.constant 0 : i32
    %c0_i32_1 = arith.constant 0 : i32
    return %c0_i32, %c0_i32_0 : i32, i32
  }
  func.func @transform_5(%arg0: i32) -> (i32, i32) {
    %c0_i32 = arith.constant 0 : i32
    %c0_i32_0 = arith.constant 0 : i32
    %c0_i32_1 = arith.constant 0 : i32
    return %c0_i32, %c0_i32_0 : i32, i32
  }
  func.func @transform_6(%arg0: i32) -> i32 {
    %c0_i32 = arith.constant 0 : i32
    %c0_i32_0 = arith.constant 0 : i32
    return %c0_i32 : i32
  }
  func.func @transform_7(%arg0: i32) -> (i32, i32) {
    %c0_i32 = arith.constant 0 : i32
    %c0_i32_0 = arith.constant 0 : i32
    return %c0_i32, %arg0 : i32, i32
  }
}

</mosaic_0001>

<bundles_post_ra>
// kernel: v_approx_forward.2
= control target key start
LH: loop header
LB: loop body
LE: loop exit
PB: predicated region body
PF: predicated region fallthrough
CT: control target
= control target key end

     0   :  { %s499_s0 = inlined_call_operand.vmem [shape: f32[32,4], index: 0, kind: input, shape index: {}]   ;;  %s500_s1 = inlined_call_operand.vmem [shape: f32[32,1], index: 1, kind: input, shape index: {}]   ;;  %s501_s2 = inlined_call_operand.vmem [shape: f32[32,32], index: 2, kind: input, shape index: {}]   ;;  %s502_s3 = inlined_call_operand.vmem [shape: f32[32,1], index: 3, kind: input, shape index: {}]   ;;  %s503_s4 = inlined_call_operand.vmem [shape: f32[32,1], index: 4, kind: input, shape index: {}]   ;;  %s504_s5 = inlined_call_operand.<no memory space> [shape: f32[1], index: 5, kind: input, shape index: {}]   ;;  %s505_s6 = inlined_call_operand.vmem [shape: f32[4,8], index: 6, kind: input, shape index: {}]   ;;  %s506_s7 = inlined_call_operand.<no memory space> [shape: f32[], index: 7, kind: input, shape index: {}]   ;;  %s507_s8 = inlined_call_operand.vmem [shape: f32[1,256], index: 8, kind: output, shape index: {}]  }
   0x1   :  { %v13_v0 = vstv %s506_s7 }
   0x2   :  { %v30_v1 = vlaneseq  ;;  %46 = vst [vmem:[#allocation8 + $0x4] sm:$0xf] %v13_v0  ;;  %v53_v2 = vld [vmem:[%s500_s1 + $0x8] sm:$0xff]  ;;  %v55_v3 = vld [vmem:[%s500_s1 + $0x18] sm:$0xff]  ;;  %v29_v4 = vld [vmem:[%s505_s6] sm:$0xf] }
   0x3   :  { %v362_v7 = vmov 0   ;;  %v52_v10 = vld [vmem:[%s500_s1] sm:$0xff]  ;;  %v54_v11 = vld [vmem:[%s500_s1 + $0x10] sm:$0xff]  ;;  %v171_v14 = vld [vmem:[%s502_s3 + $0x18] sm:$0xff]  ;;  %vm93_vm2 = vcmask 1043456   ;;  %vm80_vm3 = vcmask 31744  }
   0x4   :  { %v31_v5 = vshrl.u32 %v30_v1, 7  ;;  %v36_v6 = vand.u32 127, %v30_v1  ;;  %360 = vset.pattern.permute.xlu1 %v362_v7  ;;  %359 = vset.pattern.permute.xlu0 %v362_v7  ;;  %v170_v13 = vld [vmem:[%s502_s3 + $0x10] sm:$0xff]  ;;  %v48_v15 = vld [vmem:[%s499_s0] sm:$0xff]  ;;  %v272_v18 = vld [vmem:[%s503_s4 + $0x8] sm:$0xff]  ;;  %vm192_vm4 = vcmask 261120  }
   0x5   :  { %63 = vperm.xlu1 %360, %v53_v2   ;;  %73 = vperm.xlu0 %359, %v55_v3   ;;  %v273_v19 = vld [vmem:[%s503_s4 + $0x10] sm:$0xff]  ;;  %v49_v20 = vld [vmem:[%s499_s0 + $0x8] sm:$0xff]  ;;  %v51_v22 = vld [vmem:[%s499_s0 + $0x18] sm:$0xff]  ;;  %vm328_vm5 = vcmask 1040384   ;;  %vm333_vm6 = vcmp.lt.s32.totalorder %v30_v1, 256 }
   0x6   :  { %vm33_vm0 = vcmp.lt.s32.totalorder %v31_v5, 4  ;;  %vm38_vm1 = vcmp.lt.s32.totalorder %v36_v6, 8  ;;  %361 = vset.pattern.permute.xlu2 %v362_v7  ;;  %v50_v21 = vld [vmem:[%s499_s0 + $0x10] sm:$0xff]  ;;  %v168_v31 = vld [vmem:[%s502_s3] sm:$0xff]  ;;  %v169_v44 = vld [vmem:[%s502_s3 + $0x8] sm:$0xff] }
   0x7   :  { %v34_v8 = vsel %vm33_vm0, %v29_v4, %v13_v0  ;;  %174 = vperm.xlu2 %361, %v168_v31   ;;  %v164_v53 = vld [vmem:[%s501_s2] sm:$0xff]  ;;  %v165_v55 = vld [vmem:[%s501_s2 + $0x8] sm:$0xff]  ;;  %v274_v56 = vld [vmem:[%s503_s4 + $0x18] sm:$0xff] }
   0x8   :  { %v39_v9 = vsel %vm38_vm1, %v34_v8, %v13_v0  ;;  %v271_v54 = vld [vmem:[%s503_s4] sm:$0xff]  ;;  %v166_v57 = vld [vmem:[%s501_s2 + $0x10] sm:$0xff]  ;;  %v167_v58 = vld [vmem:[%s501_s2 + $0x18] sm:$0xff] }
   0x9   :  { %42 = vst [vmem:[#allocation8] sm:$0xf] %v39_v9 }
   0xd   :  { %58 = vperm.xlu1 %360, %v52_v10   ;;  %68 = vperm.xlu0 %359, %v54_v11  }
   0xf   :  { %179 = vperm.xlu2 %361, %v169_v44  }
  0x10   :  { %v47_v12 = vld [vmem:[#allocation8] sm:$0xff] }
  0x11   :  { %77 = vst [vmem:[#allocation1] ss:$2 sm:$0xff] %v47_v12 }
  0x15   :  { %184 = vperm.xlu0 %359, %v170_v13   ;;  %189 = vperm.xlu1 %360, %v171_v14  }
  0x17   :  { %277 = vperm.xlu2 %361, %v271_v54  }
  0x18   :  { %v78_v16 = vld.sshfl [vmem:[#allocation1] sm:$0xff pattern:$0x75316420]  ;;  %v79_v17 = vld.sshfl [vmem:[#allocation1 + $0x8] sm:$0xff pattern:$0x75316420] }
  0x19   :  { %340 = vmatpush.msk.msra.mxu0 %vm93_vm2, %v78_v16  ;;  %345 = vmatpush.msk.msra.mxu1 %vm93_vm2, %v79_v17 }
  0x1a   :  { %341 = vmatmul.msk.f32.vlgmr.msra.gmra.mxu0 %vm80_vm3, %v48_v15  ;;  %346 = vmatmul.msk.f32.vlgmr.msra.gmra.mxu1 %vm80_vm3, %v48_v15 }
  0x1d   :  { %282 = vperm.xlu0 %359, %v272_v18   ;;  %287 = vperm.xlu1 %360, %v273_v19  }
  0x1f   :  { %292 = vperm.xlu2 %361, %v274_v56  }
  0x22   :  { %342 = vmatmul.msk.f32.gmra.mxu0 %vm80_vm3, %v49_v20  ;;  %347 = vmatmul.msk.f32.gmra.mxu1 %vm80_vm3, %v49_v20 }
  0x2a   :  { %343 = vmatmul.msk.f32.gmra.mxu0 %vm80_vm3, %v50_v21  ;;  %348 = vmatmul.msk.f32.gmra.mxu1 %vm80_vm3, %v50_v21 }
  0x32   :  { %344 = vmatmul.msk.f32.gmra.mxu0 %vm80_vm3, %v51_v22  ;;  %349 = vmatmul.msk.f32.gmra.mxu1 %vm80_vm3, %v51_v22 }
  0x61   :  { %v175_v59 = vpop.permute.xlu2 %174 }
  0x69   :  { %v180_v62 = vpop.permute.xlu2 %179 }
  0x71   :  { %v278_v12 = vpop.permute.xlu2 %277 }
  0x77   :  { %v74_v27 = vpop.permute.xlu0 %73  ;;  %v64_v28 = vpop.permute.xlu1 %63 }
  0x7f   :  { %v69_v32 = vpop.permute.xlu0 %68  ;;  %v59_v39 = vpop.permute.xlu1 %58 }
  0x87   :  { %v185_v2 = vpop.permute.xlu0 %184  ;;  %v190_v3 = vpop.permute.xlu1 %189 }
  0x8f   :  { %v283_v19 = vpop.permute.xlu0 %282  ;;  %v288_v20 = vpop.permute.xlu1 %287 }
  0x97   :  { %v115_v23 = vpop.f32.mrf.mxu0  ;;  %v144_v24 = vpop.f32.mrf.mxu1 }
  0x98   :  { %v116_v45 = vadd.f32 %v115_v23, %v59_v39  ;;  %v145_v46 = vadd.f32 %v144_v24, %v59_v39 }
  0x9a   :  { %v156_v51 = vmax.f32 %v116_v45, 0.0  ;;  %v157_v52 = vmax.f32 %v145_v46, 0.0 }
  0x9f   :  { %v118_v25 = vpop.f32.mrf.mxu0  ;;  %v147_v26 = vpop.f32.mrf.mxu1 }
  0xa0   :  { %v119_v40 = vadd.f32 %v118_v25, %v64_v28  ;;  %v148_v41 = vadd.f32 %v147_v26, %v64_v28 }
  0xa2   :  { %v158_v49 = vmax.f32 %v119_v40, 0.0  ;;  %v159_v50 = vmax.f32 %v148_v41, 0.0 }
  0xa7   :  { %v121_v29 = vpop.f32.mrf.mxu0  ;;  %v150_v30 = vpop.f32.mrf.mxu1 }
  0xa8   :  { %v122_v35 = vadd.f32 %v121_v29, %v69_v32  ;;  %v151_v36 = vadd.f32 %v150_v30, %v69_v32 }
  0xaa   :  { %v160_v47 = vmax.f32 %v122_v35, 0.0  ;;  %v161_v48 = vmax.f32 %v151_v36, 0.0  ;;  %v293_v35 = vpop.permute.xlu2 %292 }
  0xaf   :  { %v124_v33 = vpop.f32.mrf.mxu0  ;;  %v153_v34 = vpop.f32.mrf.mxu1 }
  0xb0   :  { %v125_v37 = vadd.f32 %v124_v33, %v74_v27  ;;  %v154_v38 = vadd.f32 %v153_v34, %v74_v27 }
  0xb2   :  { %v162_v42 = vmax.f32 %v125_v37, 0.0  ;;  %v163_v43 = vmax.f32 %v154_v38, 0.0 }
  0xb4   :  { %217 = vmatpush.msra.mxu2 %v162_v42  ;;  %246 = vmatpush.msra.mxu3 %v163_v43 }
  0xb6   :  { %218 = vmatpush.msra.mxu2 %v160_v47  ;;  %247 = vmatpush.msra.mxu3 %v161_v48 }
  0xb8   :  { %219 = vmatpush.msra.mxu2 %v158_v49  ;;  %248 = vmatpush.msra.mxu3 %v159_v50 }
  0xba   :  { %220 = vmatpush.msra.mxu2 %v156_v51  ;;  %249 = vmatpush.msra.mxu3 %v157_v52  ;;  %v322_v52 = vstv %s504_s5 }
  0xbb   :  { %350 = vmatmul.msk.f32.vlgmr.msra.gmra.mxu2 %vm192_vm4, %v164_v53  ;;  %354 = vmatmul.msk.f32.vlgmr.msra.gmra.mxu3 %vm192_vm4, %v164_v53 }
  0xc3   :  { %351 = vmatmul.msk.f32.gmra.mxu2 %vm192_vm4, %v165_v55  ;;  %355 = vmatmul.msk.f32.gmra.mxu3 %vm192_vm4, %v165_v55 }
  0xcb   :  { %352 = vmatmul.msk.f32.gmra.mxu2 %vm192_vm4, %v166_v57  ;;  %356 = vmatmul.msk.f32.gmra.mxu3 %vm192_vm4, %v166_v57 }
  0xd3   :  { %353 = vmatmul.msk.f32.gmra.mxu2 %vm192_vm4, %v167_v58  ;;  %357 = vmatmul.msk.f32.gmra.mxu3 %vm192_vm4, %v167_v58 }
 0x13e   :  { %v222_v60 = vpop.f32.mrf.mxu2  ;;  %v251_v61 = vpop.f32.mrf.mxu3 }
 0x13f   :  { %v223_v6 = vadd.f32 %v222_v60, %v175_v59  ;;  %v252_v7 = vadd.f32 %v251_v61, %v175_v59 }
 0x141   :  { %v263_v15 = vmax.f32 %v223_v6, 0.0  ;;  %v264_v16 = vmax.f32 %v252_v7, 0.0 }
 0x143   :  { %v295_v23 = vmul.f32 %v278_v12, %v263_v15  ;;  %v296_v24 = vmul.f32 %v278_v12, %v264_v16 }
 0x146   :  { %v225_v63 = vpop.f32.mrf.mxu2  ;;  %v254_v0 = vpop.f32.mrf.mxu3 }
 0x147   :  { %v226_v4 = vadd.f32 %v225_v63, %v180_v62  ;;  %v255_v5 = vadd.f32 %v254_v0, %v180_v62 }
 0x149   :  { %v265_v13 = vmax.f32 %v226_v4, 0.0  ;;  %v266_v14 = vmax.f32 %v255_v5, 0.0 }
 0x14b   :  { %v297_v21 = vmul.f32 %v283_v19, %v265_v13  ;;  %v298_v22 = vmul.f32 %v283_v19, %v266_v14 }
 0x14d   :  { %v303_v31 = vadd.f32 %v297_v21, %v295_v23  ;;  %v312_v32 = vadd.f32 %v298_v22, %v296_v24 }
 0x14e   :  { %v228_v8 = vpop.f32.mrf.mxu2  ;;  %v257_v9 = vpop.f32.mrf.mxu3 }
 0x14f   :  { %v229_v10 = vadd.f32 %v228_v8, %v185_v2  ;;  %v258_v11 = vadd.f32 %v257_v9, %v185_v2 }
 0x151   :  { %v267_v17 = vmax.f32 %v229_v10, 0.0  ;;  %v268_v18 = vmax.f32 %v258_v11, 0.0 }
 0x153   :  { %v299_v27 = vmul.f32 %v288_v20, %v267_v17  ;;  %v300_v28 = vmul.f32 %v288_v20, %v268_v18 }
 0x155   :  { %v304_v36 = vadd.f32 %v303_v31, %v299_v27  ;;  %v313_v37 = vadd.f32 %v312_v32, %v300_v28 }
 0x156   :  { %v231_v25 = vpop.f32.mrf.mxu2  ;;  %v260_v26 = vpop.f32.mrf.mxu3 }
 0x157   :  { %v232_v29 = vadd.f32 %v231_v25, %v190_v3  ;;  %v261_v30 = vadd.f32 %v260_v26, %v190_v3 }
 0x159   :  { %v269_v33 = vmax.f32 %v232_v29, 0.0  ;;  %v270_v34 = vmax.f32 %v261_v30, 0.0 }
 0x15b   :  { %v301_v38 = vmul.f32 %v293_v35, %v269_v33  ;;  %v302_v39 = vmul.f32 %v293_v35, %v270_v34 }
 0x15d   :  { %v305_v40 = vadd.f32 %v304_v36, %v301_v38  ;;  %v314_v41 = vadd.f32 %v313_v37, %v302_v39 }
 0x15f   :  { %v306_v42 = vrot.slane %v305_v40, 4  ;;  %v315_v43 = vrot.slane %v314_v41, 4 }
 0x161   :  { %v307_v44 = vadd.f32 %v306_v42, %v305_v40  ;;  %v316_v45 = vadd.f32 %v315_v43, %v314_v41 }
 0x163   :  { %v308_v46 = vrot.slane %v307_v44, 2  ;;  %v317_v47 = vrot.slane %v316_v45, 2 }
 0x165   :  { %v309_v48 = vadd.f32 %v308_v46, %v307_v44  ;;  %v318_v49 = vadd.f32 %v317_v47, %v316_v45 }
 0x167   :  { %v310_v50 = vrot.slane %v309_v48, 1  ;;  %v319_v51 = vrot.slane %v318_v49, 1 }
 0x169   :  { %v311_v53 = vadd.f32 %v310_v50, %v309_v48  ;;  %v320_v54 = vadd.f32 %v319_v51, %v318_v49 }
 0x16b   :  { %v324_v55 = vadd.f32 %v322_v52, %v320_v54  ;;  %v323_v56 = vadd.f32 %v322_v52, %v311_v53 }
 0x16d   :  { %v327_v57 = vrot.slane %v324_v55, 7 }
 0x16f   :  { %v329_v58 = vsel %vm328_vm5, %v323_v56, %v327_v57 }
 0x170   :  { %335 = vst.msk [vmem:[%s507_s8] sm:$0x3] %vm333_vm6, %v329_v58 }

</bundles_post_ra>
